<compile_context>
chip_gen: v6e
topology: v6e:2x2x1
jax: 0.10.0
libtpu: 0.0.40
codegen_flags: <defaults>
</compile_context>

<pallas_src>
import functools

import jax
import jax.numpy as jnp
from jax.experimental import pallas as pl
from jax.experimental.pallas import tpu as pltpu


def _round_up(x, m):
    return ((x + m - 1) // m) * m


def _r_dnn_kernel(x_ref, w1_ref, b1_ref, w2_ref, b2_ref, w3_ref, b3_ref, o_ref):
    # Shapes (feature dims already padded to multiples of 128 by the wrapper):
    #   x:  (TB, D_in)    w1: (D_in, H0)   b1: (1, H0)
    #   w2: (H0, H1)      b2: (1, H1)
    #   w3: (H1, D_trt)   b3: (1, D_trt)   o:  (TB, D_trt)
    x = x_ref[...]  # native dtype: bf16 operands go to the MXU without up-cast

    # Layer 1: Linear -> ReLU (f32 accumulation, bias/ReLU on the f32 accumulator).
    h0 = jnp.dot(x, w1_ref[...], preferred_element_type=jnp.float32)
    h0 = jnp.maximum(h0 + b1_ref[...].astype(jnp.float32), 0.0)
    # Dropout(p=0.2): identity at inference time.

    # Layer 2: Linear -> ReLU.
    h1 = jnp.dot(h0.astype(w2_ref.dtype), w2_ref[...],
                 preferred_element_type=jnp.float32)
    h1 = jnp.maximum(h1 + b2_ref[...].astype(jnp.float32), 0.0)

    # Layer 3: Linear.
    out = jnp.dot(h1.astype(w3_ref.dtype), w3_ref[...],
                  preferred_element_type=jnp.float32)
    out = out + b3_ref[...].astype(jnp.float32)

    o_ref[...] = out.astype(o_ref.dtype)  # only the final store downcasts


@functools.partial(jax.jit, static_argnames=("block_b",))
def r_dnn_forward(x, params, block_b=512):
    w1, b1, w2, b2, w3, b3 = params
    B, D_in = x.shape
    H0 = w1.shape[1]
    H1 = w2.shape[1]
    D_trt = w3.shape[1]

    # ---- lane-dense padding: every feature dim -> multiple of 128 --------------
    D_in_p = _round_up(D_in, 128)
    H0_p = _round_up(H0, 128)
    H1_p = _round_up(H1, 128)
    D_trt_p = _round_up(D_trt, 128)

    # ---- batch tile: big, multiple of 8 sublanes, and split so the grid has ----
    # ---- >=2 steps when possible (keeps both v7x TensorCores busy). ------------
    tb = min(int(block_b), _round_up(B, 8))
    tb = _round_up(tb, 8)
    if B >= 16 and -(-B // tb) < 2:
        tb = _round_up(-(-B // 2), 8)
    B_p = _round_up(B, tb)
    grid = (B_p // tb,)

    # Zero-pad operands (padded rows/cols contribute nothing to the valid output
    # and are sliced off below).
    xp = jnp.pad(x, ((0, B_p - B), (0, D_in_p - D_in)))
    w1p = jnp.pad(w1, ((0, D_in_p - D_in), (0, H0_p - H0)))
    b1p = jnp.pad(b1.reshape(1, H0), ((0, 0), (0, H0_p - H0)))
    w2p = jnp.pad(w2, ((0, H0_p - H0), (0, H1_p - H1)))
    b2p = jnp.pad(b2.reshape(1, H1), ((0, 0), (0, H1_p - H1)))
    w3p = jnp.pad(w3, ((0, H1_p - H1), (0, D_trt_p - D_trt)))
    b3p = jnp.pad(b3.reshape(1, D_trt), ((0, 0), (0, D_trt_p - D_trt)))

    # ---- cost estimate: helps XLA schedule this small custom call --------------
    param_bytes = sum(int(a.size) * a.dtype.itemsize
                      for a in (w1p, b1p, w2p, b2p, w3p, b3p))
    flops = 2 * B_p * (D_in_p * H0_p + H0_p * H1_p + H1_p * D_trt_p)
    bytes_accessed = (int(xp.size) * xp.dtype.itemsize
                      + B_p * D_trt_p * x.dtype.itemsize
                      + param_bytes)
    cost = pl.CostEstimate(flops=flops, transcendentals=0,
                           bytes_accessed=bytes_accessed)

    # ---- VMEM budget: only raise the scoped limit if a big tile needs it -------
    itemsize = x.dtype.itemsize
    vmem_est = (2 * tb * D_in_p * itemsize        # double-buffered x tile
                + 2 * tb * D_trt_p * itemsize     # double-buffered out tile
                + 2 * param_bytes                 # resident (double-buffered) weights
                + 4 * tb * (H0_p + H1_p + D_trt_p))  # f32 intermediates
    vmem_limit = None
    if vmem_est > (12 << 20):
        # Leave headroom below v7x's 64 MiB physical VMEM per TensorCore.
        vmem_limit = int(min(vmem_est + (8 << 20), 56 << 20))

    full = lambda shape: pl.BlockSpec(shape, lambda i: (0,) * len(shape))

    out_p = pl.pallas_call(
        _r_dnn_kernel,
        out_shape=jax.ShapeDtypeStruct((B_p, D_trt_p), x.dtype),
        grid_spec=pltpu.PrefetchScalarGridSpec(
            num_scalar_prefetch=0,
            grid=grid,
            in_specs=[
                pl.BlockSpec((tb, D_in_p), lambda i: (i, 0)),
                full((D_in_p, H0_p)),
                full((1, H0_p)),
                full((H0_p, H1_p)),
                full((1, H1_p)),
                full((H1_p, D_trt_p)),
                full((1, D_trt_p)),
            ],
            out_specs=pl.BlockSpec((tb, D_trt_p), lambda i: (i, 0)),
        ),
        compiler_params=pltpu.CompilerParams(
            dimension_semantics=("parallel",),
            vmem_limit_bytes=vmem_limit,
        ),
        cost_estimate=cost,
    )(xp, w1p, b1p, w2p, b2p, w3p, b3p)

    # Strip batch + lane padding outside the kernel.
    return out_p[:B, :D_trt]


def init_r_dnn_params(key, D_in, D_hid, D_trt, dtype=jnp.float32):
    """Deterministic init mimicking torch.nn.Linear default (U[-1/sqrt(fan_in), +])."""
    dims = [D_in, D_hid[0], D_hid[1], D_trt]
    params = []
    for li in range(3):
        fan_in, fan_out = dims[li], dims[li + 1]
        key, kw, kb = jax.random.split(key, 3)
        bound = 1.0 / (fan_in ** 0.5)
        w = jax.random.uniform(kw, (fan_in, fan_out), dtype, -bound, bound)
        b = jax.random.uniform(kb, (1, fan_out), dtype, -bound, bound)
        params.extend([w, b])
    return tuple(params)


def r_dnn_reference(x, params):
    w1, b1, w2, b2, w3, b3 = params
    h0 = jnp.maximum(x @ w1 + b1, 0.0)
    h1 = jnp.maximum(h0 @ w2 + b2, 0.0)
    return h1 @ w3 + b3


if __name__ == "__main__":
    # Small shapes consistent with the module's forward.
    B, D_in = 32, 16
    D_hid = (64, 32)
    D_trt = 4

    key = jax.random.PRNGKey(0)
    kx, kp = jax.random.split(key)
    x = jax.random.normal(kx, (B, D_in), jnp.float32)
    params = init_r_dnn_params(kp, D_in, D_hid, D_trt)

    # f32 path.
    out = jax.block_until_ready(r_dnn_forward(x, params))
    ref = r_dnn_reference(x, params)
    assert out.shape == (B, D_trt), out.shape
    assert jnp.allclose(out, ref, atol=1e-5, rtol=1e-5), "f32 mismatch vs reference"

    # bf16 path: operands stay bf16 into the MXU (no up-cast), f32 accumulation.
    x_bf = x.astype(jnp.bfloat16)
    params_bf = tuple(p.astype(jnp.bfloat16) for p in params)
    out_bf = jax.block_until_ready(r_dnn_forward(x_bf, params_bf))
    ref_bf = r_dnn_reference(x_bf.astype(jnp.float32),
                             tuple(p.astype(jnp.float32) for p in params_bf))
    assert out_bf.shape == (B, D_trt), out_bf.shape
    assert jnp.allclose(out_bf.astype(jnp.float32), ref_bf, atol=7.5e-2, rtol=7.5e-2), \
        "bf16 mismatch vs reference"

    print("KERNEL_OK")
</pallas_src>

<mosaic_0001>
module attributes {stable_mosaic.version = 11 : i64} {
  func.func @_r_dnn_kernel(%arg0: i32, %arg1: memref<16x128xf32, #tpu.memory_space<vmem>>, %arg2: memref<128x128xf32, #tpu.memory_space<vmem>>, %arg3: memref<1x128xf32, #tpu.memory_space<vmem>>, %arg4: memref<128x128xf32, #tpu.memory_space<vmem>>, %arg5: memref<1x128xf32, #tpu.memory_space<vmem>>, %arg6: memref<128x128xf32, #tpu.memory_space<vmem>>, %arg7: memref<1x128xf32, #tpu.memory_space<vmem>>, %arg8: memref<16x128xf32, #tpu.memory_space<vmem>>) attributes {dimension_semantics = [#tpu.dimension_semantics<parallel>], iteration_bounds = array<i64: 2>, scalar_prefetch = 0 : i64, scratch_operands = 0 : i64, tpu.core_type = #tpu.core_type<tc>, window_params = [{transform_indices = @transform_0, window_bounds = array<i64: 16, 128>}, {pipeline_mode = #tpu.pipeline_mode<synchronous>, transform_indices = @transform_1, window_bounds = array<i64: 128, 128>}, {pipeline_mode = #tpu.pipeline_mode<synchronous>, transform_indices = @transform_2, window_bounds = array<i64: 1, 128>}, {pipeline_mode = #tpu.pipeline_mode<synchronous>, transform_indices = @transform_3, window_bounds = array<i64: 128, 128>}, {pipeline_mode = #tpu.pipeline_mode<synchronous>, transform_indices = @transform_4, window_bounds = array<i64: 1, 128>}, {pipeline_mode = #tpu.pipeline_mode<synchronous>, transform_indices = @transform_5, window_bounds = array<i64: 128, 128>}, {pipeline_mode = #tpu.pipeline_mode<synchronous>, transform_indices = @transform_6, window_bounds = array<i64: 1, 128>}, {transform_indices = @transform_7, window_bounds = array<i64: 16, 128>}]} {
    %c0 = arith.constant 0 : index
    %c0_0 = arith.constant 0 : index
    %0 = vector.load %arg1[%c0, %c0_0] : memref<16x128xf32, #tpu.memory_space<vmem>>, vector<16x128xf32>
    %c0_1 = arith.constant 0 : index
    %c0_2 = arith.constant 0 : index
    %1 = vector.load %arg2[%c0_1, %c0_2] : memref<128x128xf32, #tpu.memory_space<vmem>>, vector<128x128xf32>
    %cst = arith.constant dense<0.000000e+00> : vector<16x128xf32>
    %2 = tpu.matmul %0, %1, %cst {dimension_numbers = #tpu.dot_dimension_numbers<[1], [0], [0], [1], [0, 0, 1, 1], [], []>} : vector<16x128xf32>, vector<128x128xf32>, vector<16x128xf32> -> vector<16x128xf32>
    %c0_3 = arith.constant 0 : index
    %c0_4 = arith.constant 0 : index
    %3 = vector.load %arg3[%c0_3, %c0_4] : memref<1x128xf32, #tpu.memory_space<vmem>>, vector<1x128xf32>
    %4 = vector.broadcast %3 : vector<1x128xf32> to vector<16x128xf32>
    %5 = arith.addf %2, %4 : vector<16x128xf32>
    %cst_5 = arith.constant 0.000000e+00 : f32
    %6 = vector.broadcast %cst_5 : f32 to vector<16x128xf32>
    %7 = arith.maximumf %5, %6 : vector<16x128xf32>
    %c0_6 = arith.constant 0 : index
    %c0_7 = arith.constant 0 : index
    %8 = vector.load %arg4[%c0_6, %c0_7] : memref<128x128xf32, #tpu.memory_space<vmem>>, vector<128x128xf32>
    %cst_8 = arith.constant dense<0.000000e+00> : vector<16x128xf32>
    %9 = tpu.matmul %7, %8, %cst_8 {dimension_numbers = #tpu.dot_dimension_numbers<[1], [0], [0], [1], [0, 0, 1, 1], [], []>} : vector<16x128xf32>, vector<128x128xf32>, vector<16x128xf32> -> vector<16x128xf32>
    %c0_9 = arith.constant 0 : index
    %c0_10 = arith.constant 0 : index
    %10 = vector.load %arg5[%c0_9, %c0_10] : memref<1x128xf32, #tpu.memory_space<vmem>>, vector<1x128xf32>
    %11 = vector.broadcast %10 : vector<1x128xf32> to vector<16x128xf32>
    %12 = arith.addf %9, %11 : vector<16x128xf32>
    %cst_11 = arith.constant 0.000000e+00 : f32
    %13 = vector.broadcast %cst_11 : f32 to vector<16x128xf32>
    %14 = arith.maximumf %12, %13 : vector<16x128xf32>
    %c0_12 = arith.constant 0 : index
    %c0_13 = arith.constant 0 : index
    %15 = vector.load %arg6[%c0_12, %c0_13] : memref<128x128xf32, #tpu.memory_space<vmem>>, vector<128x128xf32>
    %cst_14 = arith.constant dense<0.000000e+00> : vector<16x128xf32>
    %16 = tpu.matmul %14, %15, %cst_14 {dimension_numbers = #tpu.dot_dimension_numbers<[1], [0], [0], [1], [0, 0, 1, 1], [], []>} : vector<16x128xf32>, vector<128x128xf32>, vector<16x128xf32> -> vector<16x128xf32>
    %c0_15 = arith.constant 0 : index
    %c0_16 = arith.constant 0 : index
    %17 = vector.load %arg7[%c0_15, %c0_16] : memref<1x128xf32, #tpu.memory_space<vmem>>, vector<1x128xf32>
    %18 = vector.broadcast %17 : vector<1x128xf32> to vector<16x128xf32>
    %19 = arith.addf %16, %18 : vector<16x128xf32>
    %c0_17 = arith.constant 0 : index
    %c0_18 = arith.constant 0 : index
    %20 = vector.load %arg8[%c0_17, %c0_18] : memref<16x128xf32, #tpu.memory_space<vmem>>, vector<16x128xf32>
    tpu.vector_store %arg8[%c0_17, %c0_18], %19 {strides = array<i32>} : memref<16x128xf32, #tpu.memory_space<vmem>>, vector<16x128xf32>,
    return
  }
  func.func @transform_0(%arg0: i32) -> (i32, i32) {
    %c0_i32 = arith.constant 0 : i32
    %c0_i32_0 = arith.constant 0 : i32
    return %arg0, %c0_i32 : i32, i32
  }
  func.func @transform_1(%arg0: i32) -> (i32, i32) {
    %c0_i32 = arith.constant 0 : i32
    %c0_i32_0 = arith.constant 0 : i32
    %c0_i32_1 = arith.constant 0 : i32
    return %c0_i32, %c0_i32_0 : i32, i32
  }
  func.func @transform_2(%arg0: i32) -> (i32, i32) {
    %c0_i32 = arith.constant 0 : i32
    %c0_i32_0 = arith.constant 0 : i32
    %c0_i32_1 = arith.constant 0 : i32
    return %c0_i32, %c0_i32_0 : i32, i32
  }
  func.func @transform_3(%arg0: i32) -> (i32, i32) {
    %c0_i32 = arith.constant 0 : i32
    %c0_i32_0 = arith.constant 0 : i32
    %c0_i32_1 = arith.constant 0 : i32
    return %c0_i32, %c0_i32_0 : i32, i32
  }
  func.func @transform_4(%arg0: i32) -> (i32, i32) {
    %c0_i32 = arith.constant 0 : i32
    %c0_i32_0 = arith.constant 0 : i32
    %c0_i32_1 = arith.constant 0 : i32
    return %c0_i32, %c0_i32_0 : i32, i32
  }
  func.func @transform_5(%arg0: i32) -> (i32, i32) {
    %c0_i32 = arith.constant 0 : i32
    %c0_i32_0 = arith.constant 0 : i32
    %c0_i32_1 = arith.constant 0 : i32
    return %c0_i32, %c0_i32_0 : i32, i32
  }
  func.func @transform_6(%arg0: i32) -> (i32, i32) {
    %c0_i32 = arith.constant 0 : i32
    %c0_i32_0 = arith.constant 0 : i32
    %c0_i32_1 = arith.constant 0 : i32
    return %c0_i32, %c0_i32_0 : i32, i32
  }
  func.func @transform_7(%arg0: i32) -> (i32, i32) {
    %c0_i32 = arith.constant 0 : i32
    %c0_i32_0 = arith.constant 0 : i32
    return %arg0, %c0_i32 : i32, i32
  }
}

</mosaic_0001>

<bundles_post_ra>
// kernel: r_dnn_forward.1
= control target key start
LH: loop header
LB: loop body
LE: loop exit
PB: predicated region body
PF: predicated region fallthrough
CT: control target
= control target key end

     0   :  { %s869_s24 = smov 0   ;;  %s1050_s0 = inlined_call_operand.vmem [shape: f32[32,128], index: 0, kind: input, shape index: {}]   ;;  %s1051_s1 = inlined_call_operand.vmem [shape: f32[128,128], index: 1, kind: input, shape index: {}]   ;;  %s1052_s2 = inlined_call_operand.vmem [shape: f32[1,128], index: 2, kind: input, shape index: {}]   ;;  %s1053_s3 = inlined_call_operand.vmem [shape: f32[128,128], index: 3, kind: input, shape index: {}]   ;;  %s1054_s4 = inlined_call_operand.vmem [shape: f32[1,128], index: 4, kind: input, shape index: {}]   ;;  %s1055_s5 = inlined_call_operand.vmem [shape: f32[128,128], index: 5, kind: input, shape index: {}]   ;;  %s1056_s6 = inlined_call_operand.vmem [shape: f32[1,128], index: 6, kind: input, shape index: {}]   ;;  %s1057_s7 = inlined_call_operand.vmem [shape: f32[32,128], index: 7, kind: output, shape index: {}]  }
   0x1 LB: > { %s640_s25 = sadd.s32 4294967295, %s827_s24   ;;  %p644_p0 = scmp.ge.s32.totalorder %s827_s24, 1  ;;  %s827_s24 = sphi %s869_s24, %s17_s24  }
   0x2   : > { %p238_p1 = scmp.lt.s32.totalorder %s827_s24, 3 }
   0x4   : > { %p239_p2 = pnand %p644_p0, %p238_p1 }
   0x5   : > { %s645_s30 = sshll.u32 (!%p239_p2), %s640_s25, 1 }
   0x6   : > { %242 = sbr.rel (%p239_p2) target bundleno = 642 (0x282), region = 48  ;;  %p271_p3 = scmp.lt.s32.totalorder (!%p239_p2), %s645_s30, 3 }
   0xb   : > { %v299_v0 = vld [vmem:[%s1051_s1 + $0x78] sm:$0xff]  ;;  %v298_v1 = vld [vmem:[%s1051_s1 + $0x70] sm:$0xff]  ;;  %v297_v2 = vld [vmem:[%s1051_s1 + $0x68] sm:$0xff]  ;;  %s1059_s30 = smov (!%p271_p3, %s645_s30), 3 }
   0xc   : > { %708 = vmatprep.subr.mxu0 %v299_v0  ;;  %v296_v3 = vld [vmem:[%s1051_s1 + $0x60] sm:$0xff]  ;;  %s646_s12 = sshll.u32 %s1059_s30, 3  ;;  %v399_v4 = vld [vmem:[%s1053_s3 + $0x78] sm:$0xff]  ;;  %v398_v6 = vld [vmem:[%s1053_s3 + $0x70] sm:$0xff] }
   0xd   : > { %709 = vmatpush3.msra.mxu0 %v299_v0  ;;  %v295_v5 = vld [vmem:[%s1051_s1 + $0x58] sm:$0xff]  ;;  %s903_s19 = scalar_lea.vmem %s1050_s0, %s646_s12  ;;  %743 = vmatprep.subr.mxu1 %v399_v4  ;;  %v294_v8 = vld [vmem:[%s1051_s1 + $0x50] sm:$0xff]  ;;  %v397_v9 = vld [vmem:[%s1053_s3 + $0x68] sm:$0xff]  ;;  %s280_s13 = scalar_lea.vmem %s1057_s7, %s646_s12 }
   0xe   : > { %710 = vmatprep.subr.mxu0 %v298_v1  ;;  %v282_v7 = vld [vmem:[%s903_s19] sm:$0xff]  ;;  %744 = vmatpush3.msra.mxu1 %v399_v4  ;;  %v293_v10 = vld [vmem:[%s1051_s1 + $0x48] sm:$0xff]  ;;  %v395_v13 = vld [vmem:[%s1053_s3 + $0x58] sm:$0xff] }
   0xf   : > { %711 = vmatpush3.msra.mxu0 %v298_v1  ;;  %740 = vmatprep.mubr.f32.mxu0 %v282_v7  ;;  %v396_v11 = vld [vmem:[%s1053_s3 + $0x60] sm:$0xff]  ;;  %v291_v14 = vld [vmem:[%s1051_s1 + $0x38] sm:$0xff]  ;;  %v394_v15 = vld [vmem:[%s1053_s3 + $0x50] sm:$0xff] }
  0x10   : > { %712 = vmatprep.subr.mxu0 %v297_v2  ;;  %745 = vmatprep.subr.mxu1 %v398_v6  ;;  %v292_v12 = vld [vmem:[%s1051_s1 + $0x40] sm:$0xff]  ;;  %v290_v16 = vld [vmem:[%s1051_s1 + $0x30] sm:$0xff]  ;;  %v393_v17 = vld [vmem:[%s1053_s3 + $0x48] sm:$0xff] }
  0x11   : > { %713 = vmatpush3.msra.mxu0 %v297_v2  ;;  %746 = vmatpush3.msra.mxu1 %v398_v6  ;;  %v289_v18 = vld [vmem:[%s1051_s1 + $0x28] sm:$0xff]  ;;  %v392_v19 = vld [vmem:[%s1053_s3 + $0x40] sm:$0xff]  ;;  %v391_v21 = vld [vmem:[%s1053_s3 + $0x38] sm:$0xff] }
  0x12   : > { %714 = vmatprep.subr.mxu0 %v296_v3  ;;  %747 = vmatprep.subr.mxu1 %v397_v9  ;;  %v288_v20 = vld [vmem:[%s1051_s1 + $0x20] sm:$0xff]  ;;  %v287_v22 = vld [vmem:[%s1051_s1 + $0x18] sm:$0xff]  ;;  %v390_v23 = vld [vmem:[%s1053_s3 + $0x30] sm:$0xff] }
  0x13   : > { %715 = vmatpush3.msra.mxu0 %v296_v3  ;;  %748 = vmatpush3.msra.mxu1 %v397_v9  ;;  %v286_v24 = vld [vmem:[%s1051_s1 + $0x10] sm:$0xff]  ;;  %v389_v25 = vld [vmem:[%s1053_s3 + $0x28] sm:$0xff]  ;;  %v388_v27 = vld [vmem:[%s1053_s3 + $0x20] sm:$0xff] }
  0x14   : > { %716 = vmatprep.subr.mxu0 %v295_v5  ;;  %749 = vmatprep.subr.mxu1 %v396_v11  ;;  %v285_v26 = vld [vmem:[%s1051_s1 + $0x8] sm:$0xff]  ;;  %v284_v28 = vld [vmem:[%s1051_s1] sm:$0xff]  ;;  %v387_v30 = vld [vmem:[%s1053_s3 + $0x18] sm:$0xff] }
  0x15   : > { %717 = vmatpush3.msra.mxu0 %v295_v5  ;;  %750 = vmatpush3.msra.mxu1 %v396_v11  ;;  %v283_v29 = vld [vmem:[%s903_s19 + $0x8] sm:$0xff]  ;;  %v386_v31 = vld [vmem:[%s1053_s3 + $0x10] sm:$0xff]  ;;  %v384_v33 = vld [vmem:[%s1053_s3] sm:$0xff] }
  0x16   : > { %718 = vmatprep.subr.mxu0 %v294_v8  ;;  %751 = vmatprep.subr.mxu1 %v395_v13  ;;  %v385_v32 = vld [vmem:[%s1053_s3 + $0x8] sm:$0xff]  ;;  %v499_v34 = vld [vmem:[%s1055_s5 + $0x78] sm:$0xff]  ;;  %v498_v35 = vld [vmem:[%s1055_s5 + $0x70] sm:$0xff] }
  0x17   : > { %719 = vmatpush3.msra.mxu0 %v294_v8  ;;  %752 = vmatpush3.msra.mxu1 %v395_v13  ;;  %v497_v36 = vld [vmem:[%s1055_s5 + $0x68] sm:$0xff]  ;;  %v496_v37 = vld [vmem:[%s1055_s5 + $0x60] sm:$0xff]  ;;  %v495_v38 = vld [vmem:[%s1055_s5 + $0x58] sm:$0xff] }
  0x18   : > { %720 = vmatprep.subr.mxu0 %v293_v10  ;;  %753 = vmatprep.subr.mxu1 %v394_v15  ;;  %v494_v39 = vld [vmem:[%s1055_s5 + $0x50] sm:$0xff]  ;;  %v493_v40 = vld [vmem:[%s1055_s5 + $0x48] sm:$0xff]  ;;  %v492_v41 = vld [vmem:[%s1055_s5 + $0x40] sm:$0xff] }
  0x19   : > { %721 = vmatpush3.msra.mxu0 %v293_v10  ;;  %754 = vmatpush3.msra.mxu1 %v394_v15  ;;  %v491_v42 = vld [vmem:[%s1055_s5 + $0x38] sm:$0xff]  ;;  %v490_v43 = vld [vmem:[%s1055_s5 + $0x30] sm:$0xff]  ;;  %v489_v44 = vld [vmem:[%s1055_s5 + $0x28] sm:$0xff] }
  0x1a   : > { %722 = vmatprep.subr.mxu0 %v292_v12  ;;  %755 = vmatprep.subr.mxu1 %v393_v17  ;;  %v488_v45 = vld [vmem:[%s1055_s5 + $0x20] sm:$0xff]  ;;  %v487_v53 = vld [vmem:[%s1055_s5 + $0x18] sm:$0xff]  ;;  %v486_v54 = vld [vmem:[%s1055_s5 + $0x10] sm:$0xff] }
  0x1b   : > { %723 = vmatpush3.msra.mxu0 %v292_v12  ;;  %756 = vmatpush3.msra.mxu1 %v393_v17  ;;  %v649_v46 = vld [vmem:[%s1052_s2] ss:$0 sm:$0xff]  ;;  %v485_v55 = vld [vmem:[%s1055_s5 + $0x8] sm:$0xff] }
  0x1c   : > { %724 = vmatprep.subr.mxu0 %v291_v14  ;;  %757 = vmatprep.subr.mxu1 %v392_v19  ;;  %v484_v56 = vld [vmem:[%s1055_s5] sm:$0xff] }
  0x1d   : > { %725 = vmatpush3.msra.mxu0 %v291_v14  ;;  %758 = vmatpush3.msra.mxu1 %v392_v19  ;;  %v650_v57 = vld [vmem:[%s1054_s4] ss:$0 sm:$0xff] }
  0x1e   : > { %726 = vmatprep.subr.mxu0 %v290_v16  ;;  %759 = vmatprep.subr.mxu1 %v391_v21  ;;  %v651_v1 = vld [vmem:[%s1056_s6] ss:$0 sm:$0xff] }
  0x1f   : > { %727 = vmatpush3.msra.mxu0 %v290_v16  ;;  %760 = vmatpush3.msra.mxu1 %v391_v21 }
  0x20   : > { %728 = vmatprep.subr.mxu0 %v289_v18  ;;  %761 = vmatprep.subr.mxu1 %v390_v23 }
  0x21   : > { %729 = vmatpush3.msra.mxu0 %v289_v18  ;;  %762 = vmatpush3.msra.mxu1 %v390_v23 }
  0x22   : > { %730 = vmatprep.subr.mxu0 %v288_v20  ;;  %763 = vmatprep.subr.mxu1 %v389_v25 }
  0x23   : > { %731 = vmatpush3.msra.mxu0 %v288_v20  ;;  %764 = vmatpush3.msra.mxu1 %v389_v25 }
  0x24   : > { %732 = vmatprep.subr.mxu0 %v287_v22  ;;  %765 = vmatprep.subr.mxu1 %v388_v27 }
  0x25   : > { %733 = vmatpush3.msra.mxu0 %v287_v22  ;;  %766 = vmatpush3.msra.mxu1 %v388_v27 }
  0x26   : > { %734 = vmatprep.subr.mxu0 %v286_v24  ;;  %767 = vmatprep.subr.mxu1 %v387_v30 }
  0x27   : > { %735 = vmatpush3.msra.mxu0 %v286_v24  ;;  %768 = vmatpush3.msra.mxu1 %v387_v30 }
  0x28   : > { %736 = vmatprep.subr.mxu0 %v285_v26  ;;  %769 = vmatprep.subr.mxu1 %v386_v31 }
  0x29   : > { %737 = vmatpush3.msra.mxu0 %v285_v26  ;;  %770 = vmatpush3.msra.mxu1 %v386_v31 }
  0x2a   : > { %738 = vmatprep.subr.mxu0 %v284_v28  ;;  %771 = vmatprep.subr.mxu1 %v385_v32 }
  0x2b   : > { %739 = vmatpush3.msra.mxu0 %v284_v28  ;;  %772 = vmatpush3.msra.mxu1 %v385_v32 }
  0x2c   : > { %741 = vmatmul.mubr.f32.vlgmr.msra.gmra.mxu0 %v283_v29  ;;  %773 = vmatprep.subr.mxu1 %v384_v33 }
  0x2d   : > { %774 = vmatpush3.msra.mxu1 %v384_v33  ;;  %778 = vmatprep.subr.mxu0 %v499_v34 }
  0x2e   : > { %779 = vmatpush3.msra.mxu0 %v499_v34 }
  0x2f   : > { %780 = vmatprep.subr.mxu0 %v498_v35 }
  0x30   : > { %781 = vmatpush3.msra.mxu0 %v498_v35 }
  0x31   : > { %782 = vmatprep.subr.mxu0 %v497_v36 }
  0x32   : > { %783 = vmatpush3.msra.mxu0 %v497_v36 }
  0x33   : > { %784 = vmatprep.subr.mxu0 %v496_v37 }
  0x34   : > { %785 = vmatpush3.msra.mxu0 %v496_v37 }
  0x35   : > { %786 = vmatprep.subr.mxu0 %v495_v38 }
  0x36   : > { %787 = vmatpush3.msra.mxu0 %v495_v38 }
  0x37   : > { %788 = vmatprep.subr.mxu0 %v494_v39 }
  0x38   : > { %789 = vmatpush3.msra.mxu0 %v494_v39 }
  0x39   : > { %790 = vmatprep.subr.mxu0 %v493_v40 }
  0x3a   : > { %791 = vmatpush3.msra.mxu0 %v493_v40 }
  0x3b   : > { %792 = vmatprep.subr.mxu0 %v492_v41 }
  0x3c   : > { %793 = vmatpush3.msra.mxu0 %v492_v41 }
  0x3d   : > { %794 = vmatprep.subr.mxu0 %v491_v42 }
  0x3e   : > { %795 = vmatpush3.msra.mxu0 %v491_v42 }
  0x3f   : > { %796 = vmatprep.subr.mxu0 %v490_v43 }
  0x40   : > { %797 = vmatpush3.msra.mxu0 %v490_v43 }
  0x41   : > { %798 = vmatprep.subr.mxu0 %v489_v44 }
  0x42   : > { %799 = vmatpush3.msra.mxu0 %v489_v44 }
  0x43   : > { %800 = vmatprep.subr.mxu0 %v488_v45 }
  0x44   : > { %801 = vmatpush3.msra.mxu0 %v488_v45 }
  0x45   : > { %802 = vmatprep.subr.mxu0 %v487_v53 }
  0x46   : > { %803 = vmatpush3.msra.mxu0 %v487_v53 }
  0x47   : > { %804 = vmatprep.subr.mxu0 %v486_v54 }
  0x48   : > { %805 = vmatpush3.msra.mxu0 %v486_v54 }
  0x49   : > { %806 = vmatprep.subr.mxu0 %v485_v55 }
  0x4a   : > { %807 = vmatpush3.msra.mxu0 %v485_v55 }
  0x4b   : > { %808 = vmatprep.subr.mxu0 %v484_v56 }
  0x4c   : > { %809 = vmatpush3.msra.mxu0 %v484_v56 }
  0xec   : > { %v742_v47 = vpop.f32.mrf.mxu0 }
  0xed   : > { %v379_v48 = vadd.f32 %v742_v47, %v649_v46 }
  0xee   : > { %v373_v49 = vpop.f32.mrf.mxu0 }
  0xef   : > { %v374_v50 = vadd.f32 %v649_v46, %v373_v49  ;;  %v383_v52 = vmax.f32 %v379_v48, 0.0 }
  0xf1   : > { %v382_v51 = vmax.f32 %v374_v50, 0.0 }
  0xf3   : > { %775 = vmatprep.mubr.f32.mxu1 %v382_v51 }
  0xf4   : > { %776 = vmatmul.mubr.f32.vlgmr.msra.gmra.mxu1 %v383_v52 }
 0x1b4   : > { %v777_v58 = vpop.f32.mrf.mxu1 }
 0x1b5   : > { %v479_v59 = vadd.f32 %v777_v58, %v650_v57 }
 0x1b6   : > { %v473_v60 = vpop.f32.mrf.mxu1 }
 0x1b7   : > { %v474_v61 = vadd.f32 %v650_v57, %v473_v60  ;;  %v483_v63 = vmax.f32 %v479_v59, 0.0 }
 0x1b9   : > { %v482_v62 = vmax.f32 %v474_v61, 0.0 }
 0x1bb   : > { %810 = vmatprep.mubr.f32.mxu0 %v482_v62 }
 0x1bc   : > { %811 = vmatmul.mubr.f32.vlgmr.msra.gmra.mxu0 %v483_v63 }
 0x27c   : > { %v812_v0 = vpop.f32.mrf.mxu0 }
 0x27d   : > { %v579_v4 = vadd.f32 %v812_v0, %v651_v1 }
 0x27e   : > { %v573_v2 = vpop.f32.mrf.mxu0 }
 0x27f   : > { %v574_v3 = vadd.f32 %v651_v1, %v573_v2  ;;  %583 = vst [vmem:[%s280_s13 + $0x8] sm:$0xff] %v579_v4 }
 0x281   : > { %582 = vst [vmem:[%s280_s13] sm:$0xff] %v574_v3 }
 0x282 PF: > { %s17_s24 = sadd.s32 1, %s827_s24  }
 0x283   : > { %p14_p4 = scmp.ge.s32.totalorder %s17_s24, 4  }
 0x285   :  { %16 = sbr.rel (!%p14_p4) target bundleno = 1 (0x1), region = 78 }

</bundles_post_ra>
